<compile_context>
chip_gen: v7x
topology: tpu7x:2x2x1
jax: 0.10.0
libtpu: 0.0.40
codegen_flags: <defaults>
</compile_context>

<pallas_src>
import jax
import jax.numpy as jnp
from jax import lax
from jax.experimental import pallas as pl
from jax.experimental.pallas import tpu as pltpu

K = 4  # conv / deconv kernel size (fixed by the module defaults)

# On v6e/v7x set to jnp.bfloat16 for the bf16 MXU rate (accumulation stays f32
# via preferred_element_type); loosen the self-test tolerance if you do.
COMPUTE_DTYPE = jnp.float32

# Rows (M) per grid step.  Sweep per generation: larger on v5e/v6e (128 MiB
# VMEM), keep smaller on v7x (64 MiB VMEM, 2 TensorCores).
TILE_M = 1024


# ----------------------------------------------------------------------------
# Pallas kernel: one MXU matmul + bias + PReLU per M-tile
# ----------------------------------------------------------------------------
def _mm_bias_prelu_kernel(w_ref, b_ref, a_ref, p_ref, o_ref):
    # (R, Kc) @ (Kc, TM) -> (R, TM), lane-dense along TM.
    y = jnp.dot(w_ref[...], p_ref[...], preferred_element_type=jnp.float32)
    y = y + b_ref[...]                      # (R, 1) broadcast over lanes
    alpha = a_ref[0, 0]                     # scalar PReLU slope from SMEM
    o_ref[...] = jnp.where(y > 0.0, y, alpha * y).astype(o_ref.dtype)


def _mm_bias_prelu(w2, bias, alpha, patches, tile_m=TILE_M):
    """out[r, m] = PReLU(sum_k w2[r, k] * patches[k, m] + bias[r])."""
    R, Kc = w2.shape
    Kc2, M = patches.shape
    assert Kc == Kc2

    if M <= tile_m:
        tm, m_pad = M, M                     # single full-extent block
    else:
        tm = tile_m
        m_pad = -(-M // tm) * tm
        if m_pad != M:
            patches = jnp.pad(patches, ((0, 0), (0, m_pad - M)))

    w2c = w2.astype(COMPUTE_DTYPE)
    pc = patches.astype(COMPUTE_DTYPE)
    b2 = bias.astype(jnp.float32).reshape(R, 1)
    a2 = jnp.reshape(alpha, (1, 1)).astype(jnp.float32)

    out = pl.pallas_call(
        _mm_bias_prelu_kernel,
        out_shape=jax.ShapeDtypeStruct((R, m_pad), jnp.float32),
        grid_spec=pltpu.PrefetchScalarGridSpec(
            num_scalar_prefetch=0,
            grid=(m_pad // tm,),
            in_specs=[
                pl.BlockSpec((R, Kc), lambda i: (0, 0)),   # weights, resident
                pl.BlockSpec((R, 1), lambda i: (0, 0)),    # bias, resident
                pl.BlockSpec(memory_space=pltpu.MemorySpace.SMEM),  # alpha
                pl.BlockSpec((Kc, tm), lambda i: (0, i)),  # patch tile
            ],
            out_specs=pl.BlockSpec((R, tm), lambda i: (0, i)),
        ),
        compiler_params=pltpu.CompilerParams(
            dimension_semantics=("parallel",)),
    )(w2c, b2, a2, pc)
    return out[:, :M] if m_pad != M else out


# ----------------------------------------------------------------------------
# Conv / Deconv blocks on the channel-first-flat ("CNHW") layout
# ----------------------------------------------------------------------------
def conv_down(x, w, b, alpha):
    """ConvBlock: Conv2d(k=4, s=2, p=1) + PReLU.

    x: (Cin, N, H, W);  w: (Cout, Cin, 4, 4) -> returns (Cout, N, H/2, W/2).
    """
    Cin, N, H, W = x.shape
    Cout = w.shape[0]
    Ho, Wo = H // 2, W // 2
    M = N * Ho * Wo

    xp = jnp.pad(x, ((0, 0), (0, 0), (1, 1), (1, 1)))
    taps = [xp[:, :, kh:kh + 2 * Ho:2, kw:kw + 2 * Wo:2]       # (Cin,N,Ho,Wo)
            for kh in range(K) for kw in range(K)]
    patches = jnp.stack(taps, axis=0).reshape(K * K * Cin, M)   # (16*Cin, M)
    w2 = jnp.transpose(w, (0, 2, 3, 1)).reshape(Cout, K * K * Cin)

    out = _mm_bias_prelu(w2, b, alpha, patches)                 # (Cout, M)
    return out.reshape(Cout, N, Ho, Wo)


def deconv_up(x, w_t, b, alpha):
    """DeconvBlock: ConvTranspose2d(k=4, s=2, p=1) + PReLU, 4-phase sub-pixel.

    x: (Cin, N, Hi, Wi);  w_t: (Cin, Cout, 4, 4) (PyTorch ConvTranspose2d
    layout) -> returns (Cout, N, 2*Hi, 2*Wi).

    out[co, 2m+dy, 2n+dx] = sum_{ty,tx in {0,1}, ci}
        x[ci, m-1+dy+ty, n-1+dx+tx] * w_t[ci, co, 3-dy-2*ty, 3-dx-2*tx]
    -> one matmul over shared 3x3 patches with a phase-stacked weight block.
    """
    Cin, N, Hi, Wi = x.shape
    Cout = w_t.shape[1]
    M = N * Hi * Wi

    xp = jnp.pad(x, ((0, 0), (0, 0), (1, 1), (1, 1)))
    taps = [xp[:, :, ty:ty + Hi, tx:tx + Wi]                    # (Cin,N,Hi,Wi)
            for ty in range(3) for tx in range(3)]
    patches = jnp.stack(taps, axis=0).reshape(9 * Cin, M)       # (9*Cin, M)

    # Phase-stacked weight: rows (dy, dx, co), cols (ty3, tx3, ci).
    w_all = jnp.zeros((4 * Cout, 9 * Cin), jnp.float32)
    for dy in range(2):
        for dx in range(2):
            for ty in range(2):
                for tx in range(2):
                    ty3, tx3 = dy + ty, dx + tx
                    ky, kx = 3 - dy - 2 * ty, 3 - dx - 2 * tx
                    blk = jnp.transpose(w_t[:, :, ky, kx], (1, 0))  # (Cout,Cin)
                    r0 = (dy * 2 + dx) * Cout
                    c0 = (ty3 * 3 + tx3) * Cin
                    w_all = w_all.at[r0:r0 + Cout, c0:c0 + Cin].set(blk)

    bias4 = jnp.tile(b, 4)                                      # (4*Cout,)
    out = _mm_bias_prelu(w_all, bias4, alpha, patches)          # (4*Cout, M)

    # Interleave the 4 phases: (dy,dx,co,n,hi,wi) -> (co,n,2hi+dy,2wi+dx).
    out = out.reshape(2, 2, Cout, N, Hi, Wi)
    out = jnp.transpose(out, (2, 3, 4, 0, 5, 1)).reshape(Cout, N, 2 * Hi, 2 * Wi)
    return out


# ----------------------------------------------------------------------------
# Decoder_MDCBlock1 forward (mode='iter1')
# ----------------------------------------------------------------------------
def decoder_mdcblock1_forward(ft_h, ft_l_list, params):
    num_ft = len(params["down"])          # == self.num_ft (= num_ft_arg - 1)
    L = len(ft_l_list)

    # Boundary layout change only: NCHW -> CNHW.
    x = jnp.transpose(ft_h, (1, 0, 2, 3))
    ft_l_cf = [jnp.transpose(t, (1, 0, 2, 3)) for t in ft_l_list]

    ft_h_list = []
    for i in range(L):
        ft_h_list.append(x)
        w, b, a = params["down"][num_ft - L + i]
        x = conv_down(x, w, b, a)

    ft_fusion = x
    for i in range(L):
        w, b, a = params["up"][num_ft - i - 1]
        diff = ft_fusion - ft_l_cf[i]                 # XLA fuses this
        ft_fusion = deconv_up(diff, w, b, a) + ft_h_list[L - i - 1]

    return jnp.transpose(ft_fusion, (1, 0, 2, 3))     # CNHW -> NCHW


# ----------------------------------------------------------------------------
# Pure-JAX reference (lax convolutions) for validation
# ----------------------------------------------------------------------------
def _prelu(x, a):
    return jnp.where(x > 0, x, a * x)


def _ref_down(x, w, b, a):
    y = lax.conv_general_dilated(
        x, w, window_strides=(2, 2), padding=[(1, 1), (1, 1)],
        dimension_numbers=("NCHW", "OIHW", "NCHW"))
    return _prelu(y + b.reshape(1, -1, 1, 1), a)


def _ref_up(x, w_t, b, a):
    w_conv = jnp.transpose(w_t, (1, 0, 2, 3))[:, :, ::-1, ::-1]
    y = lax.conv_general_dilated(
        x, w_conv, window_strides=(1, 1), padding=[(2, 2), (2, 2)],
        lhs_dilation=(2, 2), dimension_numbers=("NCHW", "OIHW", "NCHW"))
    return _prelu(y + b.reshape(1, -1, 1, 1), a)


def _ref_forward(ft_h, ft_l_list, params):
    num_ft = len(params["down"])
    L = len(ft_l_list)
    ft_h_list = []
    for i in range(L):
        ft_h_list.append(ft_h)
        w, b, a = params["down"][num_ft - L + i]
        ft_h = _ref_down(ft_h, w, b, a)
    ft_fusion = ft_h
    for i in range(L):
        w, b, a = params["up"][num_ft - i - 1]
        ft_fusion = _ref_up(ft_fusion - ft_l_list[i], w, b, a) \
            + ft_h_list[L - i - 1]
    return ft_fusion


# ----------------------------------------------------------------------------
# Deterministic parameter init (PyTorch-style uniform bounds)
# ----------------------------------------------------------------------------
def _init_params(key, num_filter, num_ft):
    n = num_ft - 1
    params = {"down": [], "up": []}
    for i in range(n):
        cin, cout = num_filter * 2 ** i, num_filter * 2 ** (i + 1)
        key, k1, k2 = jax.random.split(key, 3)
        bound = 1.0 / jnp.sqrt(cin * K * K)
        w = jax.random.uniform(k1, (cout, cin, K, K), jnp.float32, -bound, bound)
        b = jax.random.uniform(k2, (cout,), jnp.float32, -bound, bound)
        params["down"].append((w, b, jnp.float32(0.25)))
    for i in range(n):
        cin, cout = num_filter * 2 ** (i + 1), num_filter * 2 ** i
        key, k1, k2 = jax.random.split(key, 3)
        bound = 1.0 / jnp.sqrt(cin * K * K)
        w = jax.random.uniform(k1, (cin, cout, K, K), jnp.float32, -bound, bound)
        b = jax.random.uniform(k2, (cout,), jnp.float32, -bound, bound)
        params["up"].append((w, b, jnp.float32(0.25)))
    return params


# ----------------------------------------------------------------------------
if __name__ == "__main__":
    num_filter, num_ft = 4, 3          # -> 2 down convs, 2 up convs
    N, H, W = 2, 16, 16

    key = jax.random.PRNGKey(0)
    key, kh_key, kl0, kl1 = jax.random.split(key, 4)
    params = _init_params(key, num_filter, num_ft)

    ft_h = jax.random.normal(kh_key, (N, num_filter, H, W), jnp.float32)
    ft_l_list = [
        jax.random.normal(kl0, (N, num_filter * 4, H // 4, W // 4), jnp.float32),
        jax.random.normal(kl1, (N, num_filter * 2, H // 2, W // 2), jnp.float32),
    ]

    out = decoder_mdcblock1_forward(ft_h, ft_l_list, params)
    out = jax.block_until_ready(out)

    ref = _ref_forward(ft_h, ft_l_list, params)
    assert out.shape == ft_h.shape, (out.shape, ft_h.shape)
    assert jnp.allclose(out, ref, atol=2e-4, rtol=2e-4), \
        float(jnp.max(jnp.abs(out - ref)))

    print("KERNEL_OK")
</pallas_src>

<mosaic_0001>
module attributes {stable_mosaic.version = 11 : i64} {
  func.func @_mm_bias_prelu_kernel(%arg0: i32, %arg1: memref<8x64xf32, #tpu.memory_space<vmem>>, %arg2: memref<8x1xf32, #tpu.memory_space<vmem>>, %arg3: memref<1x1xf32, #tpu.memory_space<smem>>, %arg4: memref<64x128xf32, #tpu.memory_space<vmem>>, %arg5: memref<8x128xf32, #tpu.memory_space<vmem>>) attributes {dimension_semantics = [#tpu.dimension_semantics<parallel>], iteration_bounds = array<i64: 1>, scalar_prefetch = 0 : i64, scratch_operands = 0 : i64, tpu.core_type = #tpu.core_type<tc>, window_params = [{pipeline_mode = #tpu.pipeline_mode<synchronous>, transform_indices = @transform_0, window_bounds = array<i64: 8, 64>}, {pipeline_mode = #tpu.pipeline_mode<synchronous>, transform_indices = @transform_1, window_bounds = array<i64: 8, 1>}, {transform_indices = @transform_2, window_bounds = array<i64: 1, 1>}, {transform_indices = @transform_3, window_bounds = array<i64: 64, 128>}, {transform_indices = @transform_4, window_bounds = array<i64: 8, 128>}]} {
    %c0 = arith.constant 0 : index
    %c0_0 = arith.constant 0 : index
    %0 = vector.load %arg1[%c0, %c0_0] : memref<8x64xf32, #tpu.memory_space<vmem>>, vector<8x64xf32>
    %c0_1 = arith.constant 0 : index
    %c0_2 = arith.constant 0 : index
    %1 = vector.load %arg4[%c0_1, %c0_2] : memref<64x128xf32, #tpu.memory_space<vmem>>, vector<64x128xf32>
    %cst = arith.constant dense<0.000000e+00> : vector<8x128xf32>
    %2 = tpu.matmul %0, %1, %cst {dimension_numbers = #tpu.dot_dimension_numbers<[1], [0], [0], [1], [0, 0, 1, 1], [], []>} : vector<8x64xf32>, vector<64x128xf32>, vector<8x128xf32> -> vector<8x128xf32>
    %c0_3 = arith.constant 0 : index
    %c0_4 = arith.constant 0 : index
    %3 = vector.load %arg2[%c0_3, %c0_4] : memref<8x1xf32, #tpu.memory_space<vmem>>, vector<8x1xf32>
    %4 = vector.broadcast %3 : vector<8x1xf32> to vector<8x128xf32>
    %5 = arith.addf %2, %4 : vector<8x128xf32>
    %c0_5 = arith.constant 0 : index
    %c0_6 = arith.constant 0 : index
    %6 = memref.load %arg3[%c0_5, %c0_6] : memref<1x1xf32, #tpu.memory_space<smem>>
    %cst_7 = arith.constant 0.000000e+00 : f32
    %7 = vector.broadcast %cst_7 : f32 to vector<8x128xf32>
    %8 = arith.cmpf ogt, %5, %7 : vector<8x128xf32>
    %9 = vector.broadcast %6 : f32 to vector<8x128xf32>
    %10 = arith.mulf %9, %5 : vector<8x128xf32>
    %11 = arith.select %8, %5, %10 : vector<8x128xi1>, vector<8x128xf32>
    %c0_8 = arith.constant 0 : index
    %c0_9 = arith.constant 0 : index
    %12 = vector.load %arg5[%c0_8, %c0_9] : memref<8x128xf32, #tpu.memory_space<vmem>>, vector<8x128xf32>
    tpu.vector_store %arg5[%c0_8, %c0_9], %11 {strides = array<i32>} : memref<8x128xf32, #tpu.memory_space<vmem>>, vector<8x128xf32>,
    return
  }
  func.func @transform_0(%arg0: i32) -> (i32, i32) {
    %c0_i32 = arith.constant 0 : i32
    %c0_i32_0 = arith.constant 0 : i32
    %c0_i32_1 = arith.constant 0 : i32
    return %c0_i32, %c0_i32_0 : i32, i32
  }
  func.func @transform_1(%arg0: i32) -> (i32, i32) {
    %c0_i32 = arith.constant 0 : i32
    %c0_i32_0 = arith.constant 0 : i32
    %c0_i32_1 = arith.constant 0 : i32
    return %c0_i32, %c0_i32_0 : i32, i32
  }
  func.func @transform_2(%arg0: i32) -> (i32, i32) {
    %c0_i32 = arith.constant 0 : i32
    %c0_i32_0 = arith.constant 0 : i32
    %c0_i32_1 = arith.constant 0 : i32
    return %c0_i32, %c0_i32_0 : i32, i32
  }
  func.func @transform_3(%arg0: i32) -> (i32, i32) {
    %c0_i32 = arith.constant 0 : i32
    %c0_i32_0 = arith.constant 0 : i32
    return %c0_i32, %arg0 : i32, i32
  }
  func.func @transform_4(%arg0: i32) -> (i32, i32) {
    %c0_i32 = arith.constant 0 : i32
    %c0_i32_0 = arith.constant 0 : i32
    return %c0_i32, %arg0 : i32, i32
  }
}

</mosaic_0001>

<bundles_post_ra>
// kernel: tpu_custom_call.1
= control target key start
LH: loop header
LB: loop body
LE: loop exit
PB: predicated region body
PF: predicated region fallthrough
CT: control target
= control target key end

     0   :  { %10 = vsyncpa [#allocation4], 0  ;;  %s307_s0 = inlined_call_operand.vmem [shape: f32[8,64], index: 0, kind: input, shape index: {}]   ;;  %s308_s1 = inlined_call_operand.vmem [shape: f32[8,1], index: 1, kind: input, shape index: {}]   ;;  %s309_s2 = inlined_call_operand.<no memory space> [shape: f32[1,1], index: 2, kind: input, shape index: {}]   ;;  %s310_s3 = inlined_call_operand.hbm [shape: f32[64,128], index: 3, kind: input, shape index: {}]   ;;  %s311_s4 = inlined_call_operand.hbm [shape: f32[8,128], index: 4, kind: output, shape index: {}]  }
   0x1   :  { %11 = vsyncpa [#allocation5], 0  ;;  %s241_s15 = smov [#allocation3]   ;;  %s193_s19 = scalar_lea.hbm %s310_s3, 1024 }
   0x2   :  { %s23_s16 = sshll.u32 %s241_s15, 4  ;;  %p194_p0 = scmp.ne.s32.totalorder %s310_s3, %s193_s19  ;;  %s24_s16 = int_to_ptr.vmem [resolvable:$true] %s23_s16 }
   0x3   :  { %p197_p1 = scmp.lt.u32.totalorder %s193_s19, %s310_s3 }
   0x5   :  { %p199_p2 = pnand %p197_p1, %p194_p0 }
   0x7   :  { %202 = shalt.err (!%p199_p2)
}
   0x8   :  { %s203_s24 = scalar_lea.vmem %s24_s16, 1024  ;;  %p208_p4 = scmp.lt.s32.totalorder %s24_s16, %s24_s16 }
   0x9   :  { %p204_p3 = scmp.ne.s32.totalorder %s24_s16, %s203_s24  ;;  %p209_p5 = scmp.lt.s32.totalorder %s203_s24, %s203_s24 }
   0xb   :  { %p210_p6 = por %p209_p5, %p208_p4 }
   0xd   :  { %p211_p7 = pnand %p210_p6, %p204_p3 }
   0xf   :  { %214 = shalt.err (!%p211_p7)
}
  0x10   :  { %s242_s25 = smov 128   ;;  %s243_s26 = smov 8  }
  0x11   :  { %29 = dma.hbm_to_vmem [thread:$0]  %s310_s3, 1024, %s24_s16, [#allocation4], %s242_s25, %s242_s25, %s243_s26  }
  0x12   :  { %237 = dma.done.wait [#allocation4], 1024  }
  0x13   :  { %238 = vsyncadd [#allocation4], 4294966272  ;;  %v244_v0 = vmov 0.0|0.0   ;;  %vm245_vm0 = vmmov 0   ;;  %v246_v1 = vmov 0.0   ;;  %v247_v2 = vmov 0  }
  0x14   :  { %172 = vmatprep.subr.bf16.mxu0 %v244_v0  ;;  %169 = vmatprep.mubr.msk.f32.mxu0 %vm245_vm0, %v246_v1  ;;  %v34_v3 = vld [vmem:[#allocation3] sm:$0xff]  ;;  %v35_v4 = vld [vmem:[#allocation3 + $0x8] sm:$0xff]  ;;  %v36_v5 = vld [vmem:[#allocation3 + $0x10] sm:$0xff]  ;;  %vm48_vm1 = vcmask 523264   ;;  %v124_v19 = vstv %s309_s2  ;;  %s248_s7 = smov [#allocation6]  }
  0x15   :  { %192 = vset.pattern.permute.xlu0 %v247_v2  ;;  %v173_v6 = vpack.c.bf16 %v35_v4, %v34_v3  ;;  %v37_v7 = vld [vmem:[#allocation3 + $0x18] sm:$0xff]  ;;  %v42_v9 = vld [vmem:[%s308_s1] sm:$0xff]  ;;  %v39_v11 = vld [vmem:[#allocation3 + $0x28] sm:$0xff]  ;;  %s134_s8 = sshll.u32 %s248_s7, 4  ;;  %s135_s8 = int_to_ptr.vmem [resolvable:$true] %s134_s8 }
  0x16   :  { %v176_v8 = vpack.c.bf16 %v37_v7, %v36_v5  ;;  %v38_v10 = vld [vmem:[#allocation3 + $0x20] sm:$0xff]  ;;  %45 = vperm.xlu0 %192, %v42_v9   ;;  %v40_v13 = vld [vmem:[#allocation3 + $0x30] sm:$0xff]  ;;  %v41_v14 = vld [vmem:[#allocation3 + $0x38] sm:$0xff]  ;;  %s215_s9 = scalar_lea.vmem %s135_s8, 128  ;;  %p220_p9 = scmp.lt.s32.totalorder %s135_s8, %s135_s8 }
  0x17   :  { %174 = vmatpush3.bf16.msra.mxu0 %v173_v6  ;;  %v179_v12 = vpack.c.bf16 %v39_v11, %v38_v10  ;;  %v182_v15 = vpack.c.bf16 %v41_v14, %v40_v13  ;;  %v33_v16 = vld [vmem:[%s307_s0] sm:$0xff]  ;;  %p216_p8 = scmp.ne.s32.totalorder %s135_s8, %s215_s9  ;;  %p221_p10 = scmp.lt.s32.totalorder %s215_s9, %s215_s9 }
  0x18   :  { %175 = vmatprep.subr.bf16.mxu0 %v244_v0 }
  0x19   :  { %p222_p11 = por %p221_p10, %p220_p9 }
  0x1b   :  { %177 = vmatpush3.bf16.msra.mxu0 %v176_v8  ;;  %p223_p12 = pnand %p222_p11, %p216_p8 }
  0x1c   :  { %178 = vmatprep.subr.bf16.mxu0 %v244_v0 }
  0x1f   :  { %180 = vmatpush3.bf16.msra.mxu0 %v179_v12 }
  0x20   :  { %181 = vmatprep.subr.bf16.mxu0 %v244_v0 }
  0x23   :  { %183 = vmatpush3.bf16.msra.mxu0 %v182_v15 }
  0x26   :  { %170 = vmatmul.mubr.msk.f32.vlgmr.msra.gmra.mrb[0].mxu0 %vm48_vm1, %v33_v16 }
  0x95   :  { %v46_v17 = vpop.permute.xlu0 %45 }
  0xf9   :  { %v118_v18 = vpop.f32.mrb[0].mxu0 }
  0xfa   :  { %v119_v20 = vadd.f32 %v118_v18, %v46_v17  ;;  %v171_v21 = vpop.f32.mrb[1].mxu0 }
  0xfc   :  { %v125_v22 = vmul.f32 %v124_v19, %v119_v20  ;;  %vm123_vm2 = vcmp.gt.f32.partialorder %v119_v20, 0.0 }
  0xfe   :  { %v126_v23 = vsel %vm123_vm2, %v119_v20, %v125_v22 }
  0xff   :  { %127 = vst [vmem:[#allocation6] sm:$0xff] %v126_v23 }
 0x100   :  { %226 = shalt.err (!%p223_p12)
}
 0x101   :  { %s227_s2 = scalar_lea.hbm %s311_s4, 128 }
 0x102   :  { %p228_p13 = scmp.ne.s32.totalorder %s311_s4, %s227_s2  ;;  %p231_p0 = scmp.lt.u32.totalorder %s227_s2, %s311_s4 }
 0x104   :  { %p233_p1 = pnand %p231_p0, %p228_p13 }
 0x106   :  { %236 = shalt.err (!%p233_p1)
}
 0x107   :  { %137 = dma.vmem_to_hbm [thread:$0]  %s135_s8, 128, %s311_s4, [#allocation5]  }
 0x108   :  { %239 = dma.done.wait [#allocation5], 128  }
 0x109   :  { %240 = vsyncadd [#allocation5], 4294967168 }
 0x10a   :  { %141 = vsyncpa [#allocation4], 1 }
 0x10b   :  { %142 = vsyncpa [#allocation5], 1 }

</bundles_post_ra>
